<compile_context>
chip_gen: v5e
topology: v5e:2x2
jax: 0.10.0
libtpu: 0.0.40
codegen_flags: <defaults>
</compile_context>

<pallas_src>
import jax
import jax.numpy as jnp
from jax.experimental import pallas as pl
from jax.experimental.pallas import tpu as pltpu


def _softmax_kernel(x_ref, o_ref):
    # x_ref, o_ref: (TILE_R, H_pad) VMEM tiles. Numerically-stable softmax over
    # the lane (last) axis. Compute in f32 (required on v5e: no bf16 VPU/EUP).
    x = x_ref[...].astype(jnp.float32)
    m = jnp.max(x, axis=-1, keepdims=True)
    e = jnp.exp(x - m)
    s = jnp.sum(e, axis=-1, keepdims=True)
    inv = pl.reciprocal(s, approx=True)      # EUP vrcp (free slot)
    inv = inv * (2.0 - s * inv)              # one Newton step -> ~full f32 precision
    o_ref[...] = (e * inv).astype(o_ref.dtype)


def _round_up(x, m):
    return (x + m - 1) // m * m


def pallas_softmax_lastdim(x):
    """Softmax over the last axis of an arbitrary-rank array via a Pallas kernel."""
    orig_shape = x.shape
    orig_dtype = x.dtype
    h = orig_shape[-1]
    rows = 1
    for d in orig_shape[:-1]:
        rows *= d
    x2d = x.reshape(rows, h)

    itemsize = jnp.dtype(orig_dtype).itemsize
    # Sublane packing: f32 packs 8 rows per vreg, bf16 packs 16.
    row_align = 16 if orig_dtype == jnp.bfloat16 else 8

    # Lane-dense last dim: pad H up to a multiple of 128 with a very negative
    # value (exp -> 0, so real lanes are unaffected; all-pad rows stay finite).
    h_pad = _round_up(h, 128)

    # Tile rows: largest multiple of row_align such that double-buffered
    # input+output tiles stay within ~16 MiB (safe on v5e/v6e and on v7x's
    # smaller 64 MiB physical VMEM), capped at the measured 2048-row sweet spot.
    tile_budget_bytes = 16 * 1024 * 1024
    tile_r = tile_budget_bytes // (4 * h_pad * itemsize)   # 2 bufs x (in + out)
    tile_r = max(row_align, min(2048, tile_r))
    tile_r = min(tile_r, _round_up(rows, row_align))
    tile_r = max(row_align, (tile_r // row_align) * row_align)

    # No ragged tiles: pad rows to a multiple of tile_r (padded rows are sliced
    # off after the call, so their garbage softmax values never escape).
    rows_pad = _round_up(rows, tile_r)

    if h_pad != h or rows_pad != rows:
        neg = jnp.asarray(-1e30, dtype=orig_dtype)
        x2d = jnp.pad(
            x2d,
            ((0, rows_pad - rows), (0, h_pad - h)),
            mode="constant",
            constant_values=neg,
        )

    grid = (rows_pad // tile_r,)

    cost = pl.CostEstimate(
        flops=3 * rows_pad * h_pad,
        transcendentals=rows_pad * h_pad,
        bytes_accessed=2 * rows_pad * h_pad * itemsize,
    )

    out2d = pl.pallas_call(
        _softmax_kernel,
        out_shape=jax.ShapeDtypeStruct((rows_pad, h_pad), orig_dtype),
        grid_spec=pl.GridSpec(
            grid=grid,
            in_specs=[pl.BlockSpec((tile_r, h_pad), lambda i: (i, 0))],
            out_specs=pl.BlockSpec((tile_r, h_pad), lambda i: (i, 0)),
        ),
        compiler_params=pltpu.CompilerParams(
            # Row tiles are independent -> parallel (megacore sharding on v7x,
            # harmless on single-TC v5e/v6e).
            dimension_semantics=("parallel",),
            vmem_limit_bytes=48 * 1024 * 1024,
        ),
        cost_estimate=cost,
    )(x2d)

    out2d = out2d[:rows, :h]
    return out2d.reshape(orig_shape)


class WrapFunction:
    """JAX equivalent of the PyTorch WrapFunction nn.Module (pure passthrough)."""

    def __init__(self, wrapped_function):
        self.wrapped_function = wrapped_function

    def __call__(self, *args, **kwargs):
        return self.wrapped_function(*args, **kwargs)

    # mirror nn.Module.forward
    forward = __call__


if __name__ == "__main__":
    key = jax.random.PRNGKey(0)

    model = WrapFunction(pallas_softmax_lastdim)

    # Small shape consistent with the test module (exercises H < 128 lane padding).
    B, S, H = 2, 8, 32
    x = jax.random.normal(key, (B, S, H), dtype=jnp.float32)
    out = jax.block_until_ready(model(x))
    ref = jax.nn.softmax(x, axis=-1)
    assert out.shape == x.shape and out.dtype == x.dtype
    assert jnp.max(jnp.abs(out - ref)) < 1e-5

    # Larger shape to exercise the multi-tile pipelined path (grid > 1).
    k2 = jax.random.PRNGKey(0)
    x2 = jax.random.normal(k2, (8, 512, 256), dtype=jnp.float32)
    out2 = jax.block_until_ready(model(x2))
    ref2 = jax.nn.softmax(x2, axis=-1)
    assert out2.shape == x2.shape and out2.dtype == x2.dtype
    assert jnp.max(jnp.abs(out2 - ref2)) < 1e-5

    print("KERNEL_OK")
</pallas_src>

<mosaic_0001>
module attributes {stable_mosaic.version = 11 : i64} {
  func.func @_softmax_kernel(%arg0: i32, %arg1: memref<16x128xf32, #tpu.memory_space<vmem>>, %arg2: memref<16x128xf32, #tpu.memory_space<vmem>>) attributes {dimension_semantics = [#tpu.dimension_semantics<parallel>], iteration_bounds = array<i64: 1>, scalar_prefetch = 0 : i64, scratch_operands = 0 : i64, tpu.core_type = #tpu.core_type<tc>, window_params = [{transform_indices = @transform_0, window_bounds = array<i64: 16, 128>}, {transform_indices = @transform_1, window_bounds = array<i64: 16, 128>}]} {
    %c0 = arith.constant 0 : index
    %c0_0 = arith.constant 0 : index
    %0 = vector.load %arg1[%c0, %c0_0] : memref<16x128xf32, #tpu.memory_space<vmem>>, vector<16x128xf32>
    %cst = arith.constant dense<0xFF800000> : vector<16xf32>
    %1 = vector.multi_reduction <maximumf>, %0, %cst [1] : vector<16x128xf32> to vector<16xf32>
    %2 = vector.shape_cast %1 : vector<16xf32> to vector<16x1xf32>
    %3 = vector.broadcast %2 : vector<16x1xf32> to vector<16x128xf32>
    %4 = arith.subf %0, %3 : vector<16x128xf32>
    %5 = math.exp %4 : vector<16x128xf32>
    %cst_1 = arith.constant dense<0.000000e+00> : vector<16xf32>
    %6 = vector.multi_reduction <add>, %5, %cst_1 [1] : vector<16x128xf32> to vector<16xf32>
    %7 = vector.shape_cast %6 : vector<16xf32> to vector<16x1xf32>
    %8 = tpu.reciprocal %7 {approx = true} : vector<16x1xf32> -> vector<16x1xf32>
    %9 = arith.mulf %7, %8 : vector<16x1xf32>
    %cst_2 = arith.constant 2.000000e+00 : f32
    %10 = vector.broadcast %cst_2 : f32 to vector<16x1xf32>
    %11 = arith.subf %10, %9 : vector<16x1xf32>
    %12 = arith.mulf %8, %11 : vector<16x1xf32>
    %13 = vector.broadcast %12 : vector<16x1xf32> to vector<16x128xf32>
    %14 = arith.mulf %5, %13 : vector<16x128xf32>
    %c0_3 = arith.constant 0 : index
    %c0_4 = arith.constant 0 : index
    %15 = vector.load %arg2[%c0_3, %c0_4] : memref<16x128xf32, #tpu.memory_space<vmem>>, vector<16x128xf32>
    tpu.vector_store %arg2[%c0_3, %c0_4], %14 {strides = array<i32>} : memref<16x128xf32, #tpu.memory_space<vmem>>, vector<16x128xf32>,
    return
  }
  func.func @transform_0(%arg0: i32) -> (i32, i32) {
    %c0_i32 = arith.constant 0 : i32
    %c0_i32_0 = arith.constant 0 : i32
    return %arg0, %c0_i32 : i32, i32
  }
  func.func @transform_1(%arg0: i32) -> (i32, i32) {
    %c0_i32 = arith.constant 0 : i32
    %c0_i32_0 = arith.constant 0 : i32
    return %arg0, %c0_i32 : i32, i32
  }
}

</mosaic_0001>

<bundles_post_ra>
// kernel: tpu_custom_call.1
= control target key start
LH: loop header
LB: loop body
LE: loop exit
PB: predicated region body
PF: predicated region fallthrough
CT: control target
= control target key end

     0   :  { %6 = vsyncpa [#allocation3], 0  ;;  %s162_s0 = inlined_call_operand.hbm [shape: f32[16,128], index: 0, kind: input, shape index: {}]   ;;  %s163_s1 = inlined_call_operand.hbm [shape: f32[16,128], index: 1, kind: output, shape index: {}]  }
   0x1   :  { %7 = vsyncpa [#allocation4], 0  ;;  %s12_s8 = sshll.u32 %s162_s0, 4  ;;  %s136_s9 = smov [#allocation2]   ;;  %s13_s8 = int_to_ptr.hbm [resolvable:$true] %s12_s8 }
   0x2   :  { %s14_s10 = sshll.u32 %s136_s9, 4  ;;  %s137_s11 = smov 128   ;;  %s15_s10 = int_to_ptr.vmem [resolvable:$true] %s14_s10 }
   0x3   :  { %s138_s12 = smov 8  }
   0x4   :  { %20 = dma.hbm_to_vmem [thread:$0]  %s13_s8, 256, %s15_s10, [#allocation3], %s137_s11, %s137_s11, %s138_s12  }
   0x5   :  { %132 = dma.done.wait [#allocation3], 256  }
   0x6   :  { %133 = vsyncadd [#allocation3], 4294967040  ;;  %v25_v0 = vld [vmem:[#allocation2] sm:$0xff]  ;;  %v26_v1 = vld [vmem:[#allocation2 + $0x8] sm:$0xff]  ;;  %s139_s0 = smov [#allocation5]   ;;  %s59_s16 = sshll.u32 %s163_s1, 4  ;;  %s60_s16 = int_to_ptr.hbm [resolvable:$true] %s59_s16 }
   0x7   :  { %27 = vmax.xlane.f32.xlu0 %v25_v0  ;;  %s57_s13 = sshll.u32 %s139_s0, 4  ;;  %s58_s13 = int_to_ptr.vmem [resolvable:$true] %s57_s13 }
   0xf   :  { %29 = vmax.xlane.f32.xlu0 %v26_v1 }
  0x7a   :  { %v28_v2 = vpop.xlane.xlu0 %27 }
  0x7b   :  { %v31_v3 = vsub.f32 %v25_v0, %v28_v2 }
  0x7d   :  { %v33_v4 = vmul.f32 1.442695, %v31_v3 }
  0x7f   :  { %76 = vpow2.f32 %v33_v4 }
  0x82   :  { %v30_v5 = vpop.xlane.xlu0 %29 }
  0x83   :  { %v32_v6 = vsub.f32 %v26_v1, %v30_v5 }
  0x85   :  { %v77_v7 = vpop.eup %76  ;;  %v35_v8 = vmul.f32 1.442695, %v32_v6 }
  0x86   :  { %37 = vadd.xlane.f32.xlu1 %v77_v7 }
  0x87   :  { %78 = vpow2.f32 %v35_v8 }
  0x8d   :  { %v79_v9 = vpop.eup %78 }
  0x8e   :  { %39 = vadd.xlane.f32.xlu1 %v79_v9 }
  0xf9   :  { %v38_v10 = vpop.xlane.xlu1 %37 }
  0xfa   :  { %80 = vrcp.f32 %v38_v10 }
 0x100   :  { %v81_v11 = vpop.eup %80 }
 0x101   :  { %v43_v12 = vmul.f32 %v81_v11, %v38_v10  ;;  %v40_v13 = vpop.xlane.xlu1 %39 }
 0x102   :  { %82 = vrcp.f32 %v40_v13 }
 0x103   :  { %v45_v14 = vsub.f32 2.0, %v43_v12 }
 0x105   :  { %v47_v15 = vmul.f32 %v81_v11, %v45_v14 }
 0x107   :  { %v49_v16 = vmul.f32 %v77_v7, %v47_v15 }
 0x108   :  { %v83_v17 = vpop.eup %82 }
 0x109   :  { %51 = vst [vmem:[#allocation5] sm:$0xff] %v49_v16  ;;  %v44_v18 = vmul.f32 %v83_v17, %v40_v13 }
 0x10b   :  { %v46_v19 = vsub.f32 2.0, %v44_v18 }
 0x10d   :  { %v48_v20 = vmul.f32 %v83_v17, %v46_v19 }
 0x10f   :  { %v50_v21 = vmul.f32 %v79_v9, %v48_v20 }
 0x111   :  { %52 = vst [vmem:[#allocation5 + $0x8] sm:$0xff] %v50_v21 }
 0x112   :  { %65 = dma.vmem_to_hbm [thread:$0]  %s58_s13, 256, %s60_s16, [#allocation4], %s137_s11, %s137_s11, %s138_s12  }
 0x113   :  { %134 = dma.done.wait [#allocation4], 256  }
 0x114   :  { %135 = vsyncadd [#allocation4], 4294967040 }
 0x115   :  { %70 = vsyncpa [#allocation3], 1 }
 0x116   :  { %71 = vsyncpa [#allocation4], 1 }

</bundles_post_ra>
